<compile_context>
chip_gen: v7x
topology: tpu7x:2x2x1
jax: 0.10.0
libtpu: 0.0.40
codegen_flags: <defaults>
</compile_context>

<pallas_src>
import math

import jax
import jax.numpy as jnp
from jax.experimental import pallas as pl
from jax.experimental.pallas import tpu as pltpu


# ----------------------------- linear kernels -------------------------------

def _linear_kernel(x_ref, w_ref, b_ref, o_ref):
    o_ref[...] = (
        jnp.dot(x_ref[...], w_ref[...], preferred_element_type=jnp.float32)
        + b_ref[...]
    )


def pallas_linear(x, w_t, b):
    """x: (B, S, in_f); w_t: (in_f, out_f) pre-transposed; b: (1, out_f)."""
    B, S, in_f = x.shape
    out_f = w_t.shape[1]
    # TODO(synk): add a (tm, tn, tk) grid + f32 VMEM accumulator tiling (K axis
    # "arbitrary", M/N "parallel") once shapes grow beyond toy size; a single block
    # is exact and fastest at these tiny shapes.
    y = pl.pallas_call(
        _linear_kernel,
        out_shape=jax.ShapeDtypeStruct((B * S, out_f), jnp.float32),
    )(x.reshape(B * S, in_f), w_t, b)
    return y.reshape(B, S, out_f)


def _qkv_kernel(xq_ref, xk_ref, xv_ref, wq_ref, wk_ref, wv_ref,
                bq_ref, bk_ref, bv_ref, oq_ref, ok_ref, ov_ref):
    # Three projections fused into one launch; Q weights are pre-scaled by 1/sqrt(d).
    oq_ref[...] = (
        jnp.dot(xq_ref[...], wq_ref[...], preferred_element_type=jnp.float32)
        + bq_ref[...]
    )
    ok_ref[...] = (
        jnp.dot(xk_ref[...], wk_ref[...], preferred_element_type=jnp.float32)
        + bk_ref[...]
    )
    ov_ref[...] = (
        jnp.dot(xv_ref[...], wv_ref[...], preferred_element_type=jnp.float32)
        + bv_ref[...]
    )


def pallas_qkv_projection(queries, keys, values, qkv_params):
    """Fused Q/K/V projection: one pallas_call, three MXU matmuls."""
    (wq_t, bq), (wk_t, bk), (wv_t, bv) = qkv_params
    Bq, Sq, Fq = queries.shape
    Bk, Sk, Fk = keys.shape
    Bv, Sv, Fv = values.shape
    NH = wq_t.shape[1]
    q2, k2, v2 = pl.pallas_call(
        _qkv_kernel,
        out_shape=(
            jax.ShapeDtypeStruct((Bq * Sq, NH), jnp.float32),
            jax.ShapeDtypeStruct((Bk * Sk, NH), jnp.float32),
            jax.ShapeDtypeStruct((Bv * Sv, NH), jnp.float32),
        ),
    )(
        queries.reshape(Bq * Sq, Fq),
        keys.reshape(Bk * Sk, Fk),
        values.reshape(Bv * Sv, Fv),
        wq_t, wk_t, wv_t, bq, bk, bv,
    )
    return (
        q2.reshape(Bq, Sq, NH),
        k2.reshape(Bk, Sk, NH),
        v2.reshape(Bv, Sv, NH),
    )


# --------------------------- attention kernel ------------------------------

def _attn_kernel(valid_ref, q_ref, k_ref, v_ref, o_ref):
    # One grid step handles all heads of one batch element: (H, Sq, D) tiles.
    # All head-rows of this block share the same valid_len scalar (SMEM prefetch).
    vl = valid_ref[pl.program_id(0)]

    q = q_ref[...]  # (H, Sq, D) -- already scaled by 1/sqrt(D) via the Q weights
    k = k_ref[...]  # (H, Sk, D)
    v = v_ref[...]  # (H, Sk, D)

    # Q @ K^T without transposing K: contract the D axes, batch over heads.
    scores = jax.lax.dot_general(
        q, k,
        dimension_numbers=(((2,), (2,)), ((0,), (0,))),
        preferred_element_type=jnp.float32,
    )  # (H, Sq, Sk)

    # masked_softmax: key positions >= valid_len get -1e6 before softmax (f32).
    col = jax.lax.broadcasted_iota(jnp.int32, scores.shape, 2)
    scores = jnp.where(col < vl, scores, jnp.float32(-1e6))

    scores = scores - jnp.max(scores, axis=-1, keepdims=True)
    w = jnp.exp(scores)
    denom = jnp.sum(w, axis=-1, keepdims=True)
    w = w * pl.reciprocal(denom, approx=True)  # EUP reciprocal instead of VPU divide

    o_ref[...] = jax.lax.dot_general(
        w, v,
        dimension_numbers=(((2,), (1,)), ((0,), (0,))),
        preferred_element_type=jnp.float32,
    )


def pallas_dot_product_attention(q, k, v, valid_lens, num_heads):
    """q: (B*H, Sq, D); k, v: (B*H, Sk, D); valid_lens: (B,) int32 (per batch)."""
    BH, Sq, D = q.shape
    Sk = k.shape[1]
    B = BH // num_heads

    grid_spec = pltpu.PrefetchScalarGridSpec(
        num_scalar_prefetch=1,
        grid=(B,),
        in_specs=[
            pl.BlockSpec((num_heads, Sq, D), lambda i, vl: (i, 0, 0)),
            pl.BlockSpec((num_heads, Sk, D), lambda i, vl: (i, 0, 0)),
            pl.BlockSpec((num_heads, Sk, D), lambda i, vl: (i, 0, 0)),
        ],
        out_specs=pl.BlockSpec((num_heads, Sq, D), lambda i, vl: (i, 0, 0)),
    )
    return pl.pallas_call(
        _attn_kernel,
        out_shape=jax.ShapeDtypeStruct((BH, Sq, D), jnp.float32),
        grid_spec=grid_spec,
        compiler_params=pltpu.CompilerParams(
            # No cross-step accumulator -> parallel axis (lets v7x shard over 2 TCs).
            dimension_semantics=("parallel",)
        ),
    )(valid_lens, q, k, v)


# ------------------------- module-equivalent wrapper ------------------------

class MultiHeadAttentionPallas:
    def __init__(self, key_size, query_size, value_size, num_hiddens,
                 num_heads, dropout, rng_key):
        del dropout  # TODO(synk): dropout p=0.0 / eval mode => identity
        self.num_heads = num_heads
        ks = jax.random.split(rng_key, 8)

        def init_linear(kw, kb, in_f, out_f):
            bound = 1.0 / math.sqrt(in_f)
            w = jax.random.uniform(kw, (out_f, in_f), jnp.float32, -bound, bound)
            b = jax.random.uniform(kb, (out_f,), jnp.float32, -bound, bound)
            return w, b

        # Torch-layout parameters (kept for the pure-JAX reference check).
        self.w_q = init_linear(ks[0], ks[1], query_size, num_hiddens)
        self.w_k = init_linear(ks[2], ks[3], key_size, num_hiddens)
        self.w_v = init_linear(ks[4], ks[5], value_size, num_hiddens)
        self.w_o = init_linear(ks[6], ks[7], num_hiddens, num_hiddens)

        # Kernel-side parameters: pre-transposed (in, out) once at init so there is
        # no weight.T on the forward path, and the 1/sqrt(d_head) attention scale is
        # folded into the Q projection (weights and bias).
        d_head = num_hiddens // num_heads
        scale = jnp.float32(1.0 / math.sqrt(d_head))
        self._qkv_params = (
            (self.w_q[0].T * scale, (self.w_q[1] * scale).reshape(1, -1)),
            (self.w_k[0].T, self.w_k[1].reshape(1, -1)),
            (self.w_v[0].T, self.w_v[1].reshape(1, -1)),
        )
        self._wo_t = self.w_o[0].T
        self._bo = self.w_o[1].reshape(1, -1)

    def __call__(self, queries, keys, values, valid_lens):
        nh = self.num_heads
        B = queries.shape[0]

        # Fused Q/K/V projection: one kernel launch instead of three.
        q, k, v = pallas_qkv_projection(queries, keys, values, self._qkv_params)

        # transpose_qkv (spec): plain row-major reshape (B, S, NH) -> (B*nh, S, NH/nh)
        q = q.reshape(B * nh, q.shape[1], -1)
        k = k.reshape(keys.shape[0] * nh, k.shape[1], -1)
        v = v.reshape(values.shape[0] * nh, v.shape[1], -1)

        # repeat_interleave(valid_lens, nh) assigns valid[b] to head-rows b*nh..b*nh+nh-1,
        # which is exactly one scalar per attention grid step -> pass (B,) directly.
        if valid_lens is not None:
            vl = valid_lens.astype(jnp.int32)
        else:
            vl = jnp.full((B,), k.shape[1], dtype=jnp.int32)

        out = pallas_dot_product_attention(q, k, v, vl, nh)

        # transpose_output (spec): plain row-major reshape (B*nh, Sq, d) -> (B, Sq, d*nh)
        out = out.reshape(-1, out.shape[1], out.shape[2] * nh)
        return pallas_linear(out, self._wo_t, self._bo)


# --------------------------- pure-JAX reference -----------------------------

def reference_forward(m, queries, keys, values, valid_lens):
    def lin(x, w, b):
        return x @ w.T + b

    nh = m.num_heads
    q = lin(queries, *m.w_q).reshape(queries.shape[0] * nh, queries.shape[1], -1)
    k = lin(keys, *m.w_k).reshape(keys.shape[0] * nh, keys.shape[1], -1)
    v = lin(values, *m.w_v).reshape(values.shape[0] * nh, values.shape[1], -1)
    d = q.shape[-1]
    scores = jnp.einsum("bqd,bkd->bqk", q, k) / math.sqrt(d)
    if valid_lens is not None:
        vl = jnp.repeat(valid_lens.astype(jnp.int32), nh, axis=0)
        mask = jnp.arange(k.shape[1])[None, None, :] < vl[:, None, None]
        scores = jnp.where(mask, scores, -1e6)
    w = jax.nn.softmax(scores, axis=-1)
    out = jnp.einsum("bqk,bkd->bqd", w, v)
    out = out.reshape(-1, out.shape[1], out.shape[2] * nh)
    return lin(out, *m.w_o)


# --------------------------------- main -------------------------------------

if __name__ == "__main__":
    batch, seq, feat = 2, 8, 16
    num_hiddens, num_heads = 32, 4

    root = jax.random.PRNGKey(0)
    k_param, k_q, k_k, k_v = jax.random.split(root, 4)

    mha = MultiHeadAttentionPallas(
        key_size=feat, query_size=feat, value_size=feat,
        num_hiddens=num_hiddens, num_heads=num_heads, dropout=0.0,
        rng_key=k_param,
    )

    queries = jax.random.normal(k_q, (batch, seq, feat), jnp.float32)
    keys = jax.random.normal(k_k, (batch, seq, feat), jnp.float32)
    values = jax.random.normal(k_v, (batch, seq, feat), jnp.float32)
    valid_lens = jnp.array([4, 6], dtype=jnp.int32)

    out = mha(queries, keys, values, valid_lens)
    out = jax.block_until_ready(out)

    ref = reference_forward(mha, queries, keys, values, valid_lens)
    assert out.shape == (batch, seq, num_hiddens), out.shape
    # Tolerance relaxed vs 1e-4: the kernel uses the EUP approximate reciprocal for the
    # softmax denominator (pl.reciprocal(approx=True)); everything else is exact f32.
    assert jnp.allclose(out, ref, atol=2e-3, rtol=2e-3), "mismatch vs reference"

    print("KERNEL_OK")
</pallas_src>

<mosaic_0001>
module attributes {stable_mosaic.version = 11 : i64} {
  func.func @_qkv_kernel(%arg0: memref<16x16xf32, #tpu.memory_space<vmem>>, %arg1: memref<16x16xf32, #tpu.memory_space<vmem>>, %arg2: memref<16x16xf32, #tpu.memory_space<vmem>>, %arg3: memref<16x32xf32, #tpu.memory_space<vmem>>, %arg4: memref<16x32xf32, #tpu.memory_space<vmem>>, %arg5: memref<16x32xf32, #tpu.memory_space<vmem>>, %arg6: memref<1x32xf32, #tpu.memory_space<vmem>>, %arg7: memref<1x32xf32, #tpu.memory_space<vmem>>, %arg8: memref<1x32xf32, #tpu.memory_space<vmem>>, %arg9: memref<16x32xf32, #tpu.memory_space<vmem>>, %arg10: memref<16x32xf32, #tpu.memory_space<vmem>>, %arg11: memref<16x32xf32, #tpu.memory_space<vmem>>) attributes {dimension_semantics = [], scalar_prefetch = 0 : i64, scratch_operands = 0 : i64, tpu.core_type = #tpu.core_type<tc>} {
    %c0 = arith.constant 0 : index
    %c0_0 = arith.constant 0 : index
    %0 = vector.load %arg0[%c0, %c0_0] : memref<16x16xf32, #tpu.memory_space<vmem>>, vector<16x16xf32>
    %c0_1 = arith.constant 0 : index
    %c0_2 = arith.constant 0 : index
    %1 = vector.load %arg3[%c0_1, %c0_2] : memref<16x32xf32, #tpu.memory_space<vmem>>, vector<16x32xf32>
    %cst = arith.constant dense<0.000000e+00> : vector<16x32xf32>
    %2 = tpu.matmul %0, %1, %cst {dimension_numbers = #tpu.dot_dimension_numbers<[1], [0], [0], [1], [0, 0, 1, 1], [], []>} : vector<16x16xf32>, vector<16x32xf32>, vector<16x32xf32> -> vector<16x32xf32>
    %c0_3 = arith.constant 0 : index
    %c0_4 = arith.constant 0 : index
    %3 = vector.load %arg6[%c0_3, %c0_4] : memref<1x32xf32, #tpu.memory_space<vmem>>, vector<1x32xf32>
    %4 = vector.broadcast %3 : vector<1x32xf32> to vector<16x32xf32>
    %5 = arith.addf %2, %4 : vector<16x32xf32>
    %c0_5 = arith.constant 0 : index
    %c0_6 = arith.constant 0 : index
    %6 = vector.load %arg9[%c0_5, %c0_6] : memref<16x32xf32, #tpu.memory_space<vmem>>, vector<16x32xf32>
    tpu.vector_store %arg9[%c0_5, %c0_6], %5 {strides = array<i32>} : memref<16x32xf32, #tpu.memory_space<vmem>>, vector<16x32xf32>,
    %c0_7 = arith.constant 0 : index
    %c0_8 = arith.constant 0 : index
    %7 = vector.load %arg1[%c0_7, %c0_8] : memref<16x16xf32, #tpu.memory_space<vmem>>, vector<16x16xf32>
    %c0_9 = arith.constant 0 : index
    %c0_10 = arith.constant 0 : index
    %8 = vector.load %arg4[%c0_9, %c0_10] : memref<16x32xf32, #tpu.memory_space<vmem>>, vector<16x32xf32>
    %cst_11 = arith.constant dense<0.000000e+00> : vector<16x32xf32>
    %9 = tpu.matmul %7, %8, %cst_11 {dimension_numbers = #tpu.dot_dimension_numbers<[1], [0], [0], [1], [0, 0, 1, 1], [], []>} : vector<16x16xf32>, vector<16x32xf32>, vector<16x32xf32> -> vector<16x32xf32>
    %c0_12 = arith.constant 0 : index
    %c0_13 = arith.constant 0 : index
    %10 = vector.load %arg7[%c0_12, %c0_13] : memref<1x32xf32, #tpu.memory_space<vmem>>, vector<1x32xf32>
    %11 = vector.broadcast %10 : vector<1x32xf32> to vector<16x32xf32>
    %12 = arith.addf %9, %11 : vector<16x32xf32>
    %c0_14 = arith.constant 0 : index
    %c0_15 = arith.constant 0 : index
    %13 = vector.load %arg10[%c0_14, %c0_15] : memref<16x32xf32, #tpu.memory_space<vmem>>, vector<16x32xf32>
    tpu.vector_store %arg10[%c0_14, %c0_15], %12 {strides = array<i32>} : memref<16x32xf32, #tpu.memory_space<vmem>>, vector<16x32xf32>,
    %c0_16 = arith.constant 0 : index
    %c0_17 = arith.constant 0 : index
    %14 = vector.load %arg2[%c0_16, %c0_17] : memref<16x16xf32, #tpu.memory_space<vmem>>, vector<16x16xf32>
    %c0_18 = arith.constant 0 : index
    %c0_19 = arith.constant 0 : index
    %15 = vector.load %arg5[%c0_18, %c0_19] : memref<16x32xf32, #tpu.memory_space<vmem>>, vector<16x32xf32>
    %cst_20 = arith.constant dense<0.000000e+00> : vector<16x32xf32>
    %16 = tpu.matmul %14, %15, %cst_20 {dimension_numbers = #tpu.dot_dimension_numbers<[1], [0], [0], [1], [0, 0, 1, 1], [], []>} : vector<16x16xf32>, vector<16x32xf32>, vector<16x32xf32> -> vector<16x32xf32>
    %c0_21 = arith.constant 0 : index
    %c0_22 = arith.constant 0 : index
    %17 = vector.load %arg8[%c0_21, %c0_22] : memref<1x32xf32, #tpu.memory_space<vmem>>, vector<1x32xf32>
    %18 = vector.broadcast %17 : vector<1x32xf32> to vector<16x32xf32>
    %19 = arith.addf %16, %18 : vector<16x32xf32>
    %c0_23 = arith.constant 0 : index
    %c0_24 = arith.constant 0 : index
    %20 = vector.load %arg11[%c0_23, %c0_24] : memref<16x32xf32, #tpu.memory_space<vmem>>, vector<16x32xf32>
    tpu.vector_store %arg11[%c0_23, %c0_24], %19 {strides = array<i32>} : memref<16x32xf32, #tpu.memory_space<vmem>>, vector<16x32xf32>,
    return
  }
}

</mosaic_0001>

<bundles_post_ra>
// kernel: tpu_custom_call.1
= control target key start
LH: loop header
LB: loop body
LE: loop exit
PB: predicated region body
PF: predicated region fallthrough
CT: control target
= control target key end

     0   :  { %17 = vsyncpa [#allocation3], 0  ;;  %s934_s0 = inlined_call_operand.hbm [shape: f32[16,16], index: 0, kind: input, shape index: {}]   ;;  %s935_s1 = inlined_call_operand.hbm [shape: f32[16,16], index: 1, kind: input, shape index: {}]   ;;  %s936_s2 = inlined_call_operand.hbm [shape: f32[16,16], index: 2, kind: input, shape index: {}]   ;;  %s937_s3 = inlined_call_operand.hbm [shape: f32[16,32], index: 3, kind: input, shape index: {}]   ;;  %s938_s4 = inlined_call_operand.hbm [shape: f32[16,32], index: 4, kind: input, shape index: {}]   ;;  %s939_s5 = inlined_call_operand.vmem [shape: f32[16,32], index: 5, kind: input, shape index: {}]   ;;  %s940_s6 = inlined_call_operand.vmem [shape: f32[1,32], index: 6, kind: input, shape index: {}]   ;;  %s941_s7 = inlined_call_operand.vmem [shape: f32[1,32], index: 7, kind: input, shape index: {}]   ;;  %s942_s8 = inlined_call_operand.vmem [shape: f32[1,32], index: 8, kind: input, shape index: {}]   ;;  %s943_s9 = inlined_call_operand.hbm [shape: f32[16,32], index: 9, kind: output, shape index: {0}]   ;;  %s944_s10 = inlined_call_operand.hbm [shape: f32[16,32], index: 10, kind: output, shape index: {1}]   ;;  %s945_s11 = inlined_call_operand.hbm [shape: f32[16,32], index: 11, kind: output, shape index: {2}]  }
   0x1   :  { %18 = vsyncpa [#allocation6], 0 }
   0x2   :  { %19 = vsyncpa [#allocation9], 0 }
   0x3   :  { %20 = vsyncpa [#allocation4], 0 }
   0x4   :  { %21 = vsyncpa [#allocation13], 0  ;;  %s689_s17 = smov [#allocation5]   ;;  %s690_s19 = smov [#allocation8]  }
   0x5   :  { %s39_s18 = sshll.u32 %s689_s17, 4  ;;  %s63_s20 = sshll.u32 %s690_s19, 4  ;;  %s40_s18 = int_to_ptr.vmem [resolvable:$true] %s39_s18  ;;  %s759_s20 = int_to_ptr.vmem [resolvable:$true] %s63_s20 }
   0x6   :  { %s503_s23 = scalar_lea.hbm %s935_s1, 256 }
   0x7   :  { %p504_p0 = scmp.ne.s32.totalorder %s935_s1, %s503_s23  ;;  %p507_p1 = scmp.lt.u32.totalorder %s503_s23, %s935_s1 }
   0x9   :  { %p509_p2 = pnand %p507_p1, %p504_p0 }
   0xb   :  { %512 = shalt.err (!%p509_p2)
}
   0xc   :  { %s513_s28 = scalar_lea.vmem %s40_s18, 256  ;;  %p518_p4 = scmp.lt.s32.totalorder %s40_s18, %s40_s18 }
   0xd   :  { %p514_p3 = scmp.ne.s32.totalorder %s40_s18, %s513_s28  ;;  %p519_p5 = scmp.lt.s32.totalorder %s513_s28, %s513_s28 }
   0xf   :  { %p520_p6 = por %p519_p5, %p518_p4 }
  0x11   :  { %p521_p7 = pnand %p520_p6, %p514_p3 }
  0x13   :  { %524 = shalt.err (!%p521_p7)
}
  0x14   :  { %s691_s29 = smov 128   ;;  %s692_s30 = smov 8  }
  0x15   :  { %45 = dma.hbm_to_vmem [thread:$0]  %s935_s1, 256, %s40_s18, [#allocation6], %s691_s29, %s691_s29, %s692_s30  }
  0x16   :  { %s525_s16 = scalar_lea.hbm %s937_s3, 256 }
  0x17   :  { %p526_p8 = scmp.ne.s32.totalorder %s937_s3, %s525_s16  ;;  %p529_p9 = scmp.lt.u32.totalorder %s525_s16, %s937_s3 }
  0x19   :  { %p531_p10 = pnand %p529_p9, %p526_p8 }
  0x1b   :  { %534 = shalt.err (!%p531_p10)
}
  0x1c   :  { %s535_s23 = scalar_lea.vmem %s759_s20, 256  ;;  %p540_p12 = scmp.lt.s32.totalorder %s759_s20, %s759_s20 }
  0x1d   :  { %p536_p11 = scmp.ne.s32.totalorder %s759_s20, %s535_s23  ;;  %p541_p13 = scmp.lt.s32.totalorder %s535_s23, %s535_s23 }
  0x1f   :  { %p542_p0 = por %p541_p13, %p540_p12 }
  0x21   :  { %p543_p1 = pnand %p542_p0, %p536_p11 }
  0x23   :  { %546 = shalt.err (!%p543_p1)
}
  0x24   :  { %69 = dma.hbm_to_vmem [thread:$0]  %s937_s3, 256, %s759_s20, [#allocation9], %s691_s29, %s691_s29, %s692_s30  }
  0x25   :  { %s693_s24 = smov [#allocation2]   ;;  %s694_s26 = smov [#allocation7]  }
  0x26   :  { %s27_s25 = sshll.u32 %s693_s24, 4  ;;  %s51_s27 = sshll.u32 %s694_s26, 4  ;;  %s28_s25 = int_to_ptr.vmem [resolvable:$true] %s27_s25  ;;  %s796_s27 = int_to_ptr.vmem [resolvable:$true] %s51_s27 }
  0x27   :  { %s547_s13 = scalar_lea.hbm %s934_s0, 256 }
  0x28   :  { %p548_p2 = scmp.ne.s32.totalorder %s934_s0, %s547_s13  ;;  %p551_p3 = scmp.lt.u32.totalorder %s547_s13, %s934_s0 }
  0x2a   :  { %p553_p4 = pnand %p551_p3, %p548_p2 }
  0x2c   :  { %556 = shalt.err (!%p553_p4)
}
  0x2d   :  { %s557_s3 = scalar_lea.vmem %s28_s25, 256  ;;  %p562_p6 = scmp.lt.s32.totalorder %s28_s25, %s28_s25 }
  0x2e   :  { %p558_p5 = scmp.ne.s32.totalorder %s28_s25, %s557_s3  ;;  %p563_p7 = scmp.lt.s32.totalorder %s557_s3, %s557_s3 }
  0x30   :  { %p564_p8 = por %p563_p7, %p562_p6 }
  0x32   :  { %p565_p9 = pnand %p564_p8, %p558_p5 }
  0x34   :  { %568 = shalt.err (!%p565_p9)
}
  0x35   :  { %33 = dma.hbm_to_vmem [thread:$0]  %s934_s0, 256, %s28_s25, [#allocation3], %s691_s29, %s691_s29, %s692_s30  }
  0x36   :  { %s569_s23 = scalar_lea.hbm %s936_s2, 256 }
  0x37   :  { %p570_p10 = scmp.ne.s32.totalorder %s936_s2, %s569_s23  ;;  %p573_p11 = scmp.lt.u32.totalorder %s569_s23, %s936_s2 }
  0x39   :  { %p575_p12 = pnand %p573_p11, %p570_p10 }
  0x3b   :  { %578 = shalt.err (!%p575_p12)
}
  0x3c   :  { %s579_s28 = scalar_lea.vmem %s796_s27, 256  ;;  %p584_p0 = scmp.lt.s32.totalorder %s796_s27, %s796_s27 }
  0x3d   :  { %p580_p13 = scmp.ne.s32.totalorder %s796_s27, %s579_s28  ;;  %p585_p1 = scmp.lt.s32.totalorder %s579_s28, %s579_s28 }
  0x3f   :  { %p586_p2 = por %p585_p1, %p584_p0 }
  0x41   :  { %p587_p3 = pnand %p586_p2, %p580_p13 }
  0x43   :  { %590 = shalt.err (!%p587_p3)
}
  0x44   :  { %57 = dma.hbm_to_vmem [thread:$0]  %s936_s2, 256, %s796_s27, [#allocation6], %s691_s29, %s691_s29, %s692_s30  }
  0x45   :  { %s695_s12 = smov [#allocation10]   ;;  %s591_s16 = scalar_lea.hbm %s938_s4, 256 }
  0x46   :  { %s75_s13 = sshll.u32 %s695_s12, 4  ;;  %p592_p4 = scmp.ne.s32.totalorder %s938_s4, %s591_s16  ;;  %s76_s13 = int_to_ptr.vmem [resolvable:$true] %s75_s13 }
  0x47   :  { %p595_p5 = scmp.lt.u32.totalorder %s591_s16, %s938_s4 }
  0x49   :  { %p597_p6 = pnand %p595_p5, %p592_p4 }
  0x4b   :  { %600 = shalt.err (!%p597_p6)
}
  0x4c   :  { %s601_s21 = scalar_lea.vmem %s76_s13, 256  ;;  %p606_p8 = scmp.lt.s32.totalorder %s76_s13, %s76_s13 }
  0x4d   :  { %p602_p7 = scmp.ne.s32.totalorder %s76_s13, %s601_s21  ;;  %p607_p9 = scmp.lt.s32.totalorder %s601_s21, %s601_s21 }
  0x4f   :  { %p608_p10 = por %p607_p9, %p606_p8 }
  0x51   :  { %p609_p11 = pnand %p608_p10, %p602_p7 }
  0x53   :  { %612 = shalt.err (!%p609_p11)
}
  0x54   :  { %81 = dma.hbm_to_vmem [thread:$0]  %s938_s4, 256, %s76_s13, [#allocation9], %s691_s29, %s691_s29, %s692_s30  }
  0x55   :  { %679 = dma.done.wait [#allocation3], 256  }
  0x56   :  { %680 = vsyncadd [#allocation3], 4294967040 }
  0x57   :  { %681 = dma.done.wait [#allocation6], 512  }
  0x58   :  { %682 = vsyncadd [#allocation6], 4294966784 }
  0x59   :  { %683 = dma.done.wait [#allocation9], 512  }
  0x5a   :  { %684 = vsyncadd [#allocation9], 4294966784  ;;  %vm116_vm0 = vcmask 130048   ;;  %v107_v0 = vld [vmem:[#allocation8] sm:$0xff]  ;;  %v108_v1 = vld [vmem:[#allocation8 + $0x8] sm:$0xff]  ;;  %s696_s28 = smov [#allocation11]  }
  0x5b   :  { %v105_v2 = vld [vmem:[#allocation2] sm:$0xff]  ;;  %v481_v3 = vpack.c.bf16 %v108_v1, %v107_v0  ;;  %v204_v5 = vld [vmem:[#allocation10 + $0x8] sm:$0xff]  ;;  %v201_v9 = vld [vmem:[#allocation5] sm:$0xff]  ;;  %s394_s0 = sshll.u32 %s696_s28, 4  ;;  %vm198_vm1 = vcmask 261120   ;;  %s697_s25 = smov [#allocation12]   ;;  %s395_s0 = int_to_ptr.vmem [resolvable:$true] %s394_s0 }
  0x5c   :  { %464 = vmatprep.mubr.msk.f32.mxu0 %vm116_vm0, %v105_v2  ;;  %v203_v4 = vld [vmem:[#allocation10] sm:$0xff]  ;;  %v298_v8 = vld [vmem:[%s939_s5 + $0x8] sm:$0xff]  ;;  %471 = vmatprep.mubr.msk.f32.mxu1 %vm116_vm0, %v201_v9  ;;  %v202_v12 = vld [vmem:[#allocation5 + $0x8] sm:$0xff]  ;;  %s406_s12 = sshll.u32 %s697_s25, 4  ;;  %s698_s13 = smov [#allocation14]   ;;  %s870_s12 = int_to_ptr.vmem [resolvable:$true] %s406_s12 }
  0x5d   :  { %v485_v6 = vpack.c.bf16 %v204_v5, %v203_v4  ;;  %v297_v7 = vld [vmem:[%s939_s5] sm:$0xff]  ;;  %482 = vmatprep.subr.bf16.mxu0 %v481_v3  ;;  %v106_v11 = vld [vmem:[#allocation2 + $0x8] sm:$0xff]  ;;  %s418_s14 = sshll.u32 %s698_s13, 4  ;;  %p618_p13 = scmp.lt.s32.totalorder %s395_s0, %s395_s0  ;;  %s874_s14 = int_to_ptr.vmem [resolvable:$true] %s418_s14 }
  0x5e   :  { %v489_v10 = vpack.c.bf16 %v298_v8, %v297_v7  ;;  %484 = vmatpush3.bf16.msra.mxu0 %v481_v3  ;;  %v295_v13 = vld [vmem:[#allocation7] sm:$0xff]  ;;  %v296_v14 = vld [vmem:[#allocation7 + $0x8] sm:$0xff] }
  0x5f   :  { %486 = vmatprep.subr.bf16.mxu1 %v485_v6  ;;  %v439_v15 = vld [vmem:[%s940_s6] ss:$0 sm:$0xff] }
  0x60   :  { %488 = vmatpush3.bf16.msra.mxu1 %v485_v6  ;;  %490 = vmatprep.subr.bf16.mxu0 %v489_v10  ;;  %v442_v16 = vld [vmem:[%s941_s7] ss:$0 sm:$0xff]  ;;  %s613_s7 = scalar_lea.vmem %s395_s0, 256 }
  0x61   :  { %465 = vmatmul.mubr.msk.f32.vlgmr.msra.gmra.mrb[0].mxu0 %vm116_vm0, %v106_v11  ;;  %v445_v24 = vld [vmem:[%s942_s8] ss:$0 sm:$0xff]  ;;  %p614_p12 = scmp.ne.s32.totalorder %s395_s0, %s613_s7  ;;  %p619_p0 = scmp.lt.s32.totalorder %s613_s7, %s613_s7 }
  0x62   :  { %492 = vmatpush3.bf16.msra.mxu0 %v489_v10  ;;  %478 = vmatprep.mubr.msk.f32.mxu0 %vm116_vm0, %v295_v13 }
  0x63   :  { %472 = vmatmul.mubr.msk.f32.vlgmr.msra.gmra.mrb[0].mxu1 %vm116_vm0, %v202_v12  ;;  %p620_p1 = por %p619_p0, %p618_p13 }
  0x65   :  { %479 = vmatmul.mubr.msk.f32.vlgmr.msra.gmra.mrb[2].mxu0 %vm116_vm0, %v296_v14  ;;  %p621_p2 = pnand %p620_p1, %p614_p12 }
 0x134   :  { %v466_v17 = vpop.f32.mrb[0].mxu0 }
 0x135   :  { %v195_v18 = vadd.f32 %v466_v17, %v439_v15  ;;  %v189_v19 = vpop.f32.mrb[1].mxu0 }
 0x136   :  { %v473_v20 = vpop.f32.mrb[0].mxu1  ;;  %v190_v21 = vadd.f32 %v439_v15, %v189_v19 }
 0x137   :  { %v290_v22 = vadd.f32 %v473_v20, %v442_v16  ;;  %v284_v23 = vpop.f32.mrb[1].mxu1  ;;  %200 = vst.msk [vmem:[#allocation11 + $0x8] sm:$0xff] %vm198_vm1, %v195_v18 }
 0x138   :  { %v285_v25 = vadd.f32 %v442_v16, %v284_v23  ;;  %v480_v26 = vpop.f32.mrb[2].mxu0  ;;  %199 = vst.msk [vmem:[#allocation11] sm:$0xff] %vm198_vm1, %v190_v21 }
 0x139   :  { %294 = vst.msk [vmem:[#allocation12 + $0x8] sm:$0xff] %vm198_vm1, %v290_v22  ;;  %v384_v27 = vadd.f32 %v480_v26, %v445_v24  ;;  %v378_v28 = vpop.f32.mrb[3].mxu0 }
 0x13a   :  { %293 = vst.msk [vmem:[#allocation12] sm:$0xff] %vm198_vm1, %v285_v25 }
 0x13b   :  { %624 = shalt.err (!%p621_p2)
}
 0x13c   :  { %s625_s17 = scalar_lea.hbm %s943_s9, 256 }
 0x13d   :  { %p626_p3 = scmp.ne.s32.totalorder %s943_s9, %s625_s17  ;;  %p629_p4 = scmp.lt.u32.totalorder %s625_s17, %s943_s9 }
 0x13f   :  { %p631_p5 = pnand %p629_p4, %p626_p3 }
 0x141   :  { %634 = shalt.err (!%p631_p5)
}
 0x142   :  { %400 = dma.vmem_to_hbm [thread:$0]  %s395_s0, 256, %s943_s9, [#allocation4], %s691_s29, %s691_s29, %s692_s30   ;;  %v379_v29 = vadd.f32 %v445_v24, %v378_v28 }
 0x143   :  { %s635_s22 = scalar_lea.vmem %s870_s12, 256  ;;  %p640_p7 = scmp.lt.s32.totalorder %s870_s12, %s870_s12 }
 0x144   :  { %p636_p6 = scmp.ne.s32.totalorder %s870_s12, %s635_s22  ;;  %p641_p8 = scmp.lt.s32.totalorder %s635_s22, %s635_s22 }
 0x146   :  { %p642_p9 = por %p641_p8, %p640_p7 }
 0x148   :  { %p643_p10 = pnand %p642_p9, %p636_p6 }
 0x14a   :  { %646 = shalt.err (!%p643_p10)
}
 0x14b   :  { %s647_s1 = scalar_lea.hbm %s944_s10, 256 }
 0x14c   :  { %p648_p11 = scmp.ne.s32.totalorder %s944_s10, %s647_s1  ;;  %p651_p12 = scmp.lt.u32.totalorder %s647_s1, %s944_s10 }
 0x14e   :  { %p653_p13 = pnand %p651_p12, %p648_p11 }
 0x150   :  { %656 = shalt.err (!%p653_p13)
}
 0x151   :  { %412 = dma.vmem_to_hbm [thread:$0]  %s870_s12, 256, %s944_s10, [#allocation13], %s691_s29, %s691_s29, %s692_s30   ;;  %388 = vst.msk [vmem:[#allocation14 + $0x8] sm:$0xff] %vm198_vm1, %v384_v27  ;;  %387 = vst.msk [vmem:[#allocation14] sm:$0xff] %vm198_vm1, %v379_v29 }
 0x152   :  { %s657_s0 = scalar_lea.vmem %s874_s14, 256  ;;  %p662_p1 = scmp.lt.s32.totalorder %s874_s14, %s874_s14 }
 0x153   :  { %p658_p0 = scmp.ne.s32.totalorder %s874_s14, %s657_s0  ;;  %p663_p2 = scmp.lt.s32.totalorder %s657_s0, %s657_s0 }
 0x155   :  { %p664_p3 = por %p663_p2, %p662_p1 }
 0x157   :  { %p665_p4 = pnand %p664_p3, %p658_p0 }
 0x159   :  { %668 = shalt.err (!%p665_p4)
}
 0x15a   :  { %s669_s15 = scalar_lea.hbm %s945_s11, 256 }
 0x15b   :  { %p670_p5 = scmp.ne.s32.totalorder %s945_s11, %s669_s15  ;;  %p673_p6 = scmp.lt.u32.totalorder %s669_s15, %s945_s11 }
 0x15d   :  { %p675_p7 = pnand %p673_p6, %p670_p5 }
 0x15f   :  { %678 = shalt.err (!%p675_p7)
}
 0x160   :  { %424 = dma.vmem_to_hbm [thread:$0]  %s874_s14, 256, %s945_s11, [#allocation13], %s691_s29, %s691_s29, %s692_s30  }
 0x161   :  { %685 = dma.done.wait [#allocation4], 256  }
 0x162   :  { %686 = vsyncadd [#allocation4], 4294967040 }
 0x163   :  { %687 = dma.done.wait [#allocation13], 512  }
 0x164   :  { %688 = vsyncadd [#allocation13], 4294966784 }
 0x165   :  { %434 = vsyncpa [#allocation3], 1 }
 0x166   :  { %435 = vsyncpa [#allocation6], 1 }
 0x167   :  { %436 = vsyncpa [#allocation9], 1 }
 0x168   :  { %437 = vsyncpa [#allocation4], 1 }
 0x169   :  { %438 = vsyncpa [#allocation13], 1 }

</bundles_post_ra>
